<compile_context>
chip_gen: v7x
topology: tpu7x:2x2x1
jax: 0.10.0
libtpu: 0.0.40
codegen_flags: <defaults>
</compile_context>

<pallas_src>
import math

import jax
import jax.numpy as jnp
from jax.experimental import pallas as pl
from jax.experimental.pallas import tpu as pltpu


# ----------------------------------------------------------------------------
# small static helpers (Python ints only — pure glue)
# ----------------------------------------------------------------------------
def _cdiv(a, b):
    return -(-a // b)


def _round_up(a, b):
    return _cdiv(a, b) * b


def _pad_flat(a, total, fill):
    """Flatten row-major and pad with `fill` up to `total` elements."""
    flat = a.reshape(-1)
    pad = total - flat.shape[0]
    if pad == 0:
        return flat
    return jnp.concatenate([flat, jnp.full((pad,), fill, flat.dtype)])


# ----------------------------------------------------------------------------
# std = |rho| ** 1.5   (element-wise, sublane-dense (R, 128) layout, tiled grid)
# ----------------------------------------------------------------------------
_STD_LANES = 128
_STD_MAX_TILE_ROWS = 512          # 512*128*4B = 256 KiB per buffer


def _rho_to_std_kernel(rho_ref, out_ref):
    a = jnp.abs(rho_ref[...].astype(jnp.float32))
    out_ref[...] = (a * jnp.sqrt(a)).astype(out_ref.dtype)   # |rho|^1.5, no power


def rho_to_std(rho):
    """Pallas version of _rho_to_std; returns an array with rho's original shape."""
    shape, dtype = rho.shape, rho.dtype
    n = rho.size
    rows = _cdiv(n, _STD_LANES)
    tile_rows = min(_STD_MAX_TILE_ROWS, _round_up(rows, 8))
    rows_p = _round_up(rows, tile_rows)

    x = _pad_flat(rho, rows_p * _STD_LANES, 0).reshape(rows_p, _STD_LANES)

    out = pl.pallas_call(
        _rho_to_std_kernel,
        out_shape=jax.ShapeDtypeStruct((rows_p, _STD_LANES), dtype),
        grid_spec=pltpu.PrefetchScalarGridSpec(
            num_scalar_prefetch=0,
            grid=(rows_p // tile_rows,),
            in_specs=[pl.BlockSpec((tile_rows, _STD_LANES), lambda i: (i, 0))],
            out_specs=pl.BlockSpec((tile_rows, _STD_LANES), lambda i: (i, 0)),
        ),
        compiler_params=pltpu.CompilerParams(dimension_semantics=("parallel",)),
    )(x)
    return out.reshape(-1)[:n].reshape(shape)


# ----------------------------------------------------------------------------
# Penalty: fused weight+bias KL-like reduction, tiled + accumulator + epilogue
# ----------------------------------------------------------------------------
_PEN_LANES = 1024                 # lane-dense block width (multiple of 128)
_PEN_MAX_TILE_ROWS = 256          # 256*1024*4B = 1 MiB per input block
_PEN_SPLITS = 2                   # leading 'parallel' axis: one partial per split


def _penalty_kernel(w_ref, w_in_ref, rho_ref, var_in_ref, out_ref, acc_ref):
    step = pl.program_id(1)

    @pl.when(step == 0)
    def _init():
        acc_ref[...] = jnp.zeros_like(acc_ref)

    w = w_ref[...].astype(jnp.float32)
    w_in = w_in_ref[...].astype(jnp.float32)
    rho = rho_ref[...].astype(jnp.float32)
    var_in = var_in_ref[...].astype(jnp.float32)

    a = jnp.abs(rho)
    var = a * a * a                      # std^2 = (|rho|^1.5)^2 = |rho|^3
    diff = w - w_in
    term = (diff * diff + (var - var_in)) / var_in + (jnp.log(var_in) - jnp.log(var))
    acc_ref[...] += term                 # element-wise partials: VPU-only steady state

    @pl.when(step == pl.num_programs(1) - 1)
    def _finalize():                     # single cross-lane reduce in the epilogue
        out_ref[...] = (0.5 * jnp.sum(acc_ref[...])).reshape(1, 1, 1)


def _penalty_sum(w, w_in, rho, var_in):
    """Scalar penalty over flattened-and-concatenated parameter slabs."""
    n = w.shape[0]
    rows = _cdiv(n, _PEN_LANES)
    tile_rows = min(_PEN_MAX_TILE_ROWS, _round_up(rows, 8))
    rows_p = _round_up(rows, _PEN_SPLITS * tile_rows)
    bps = rows_p // (_PEN_SPLITS * tile_rows)      # grid steps per split
    total = rows_p * _PEN_LANES

    # Zero-contribution padding: w = w_in = 0, rho = var_in = 1  ->  term == 0.
    w_p = _pad_flat(w, total, 0).reshape(rows_p, _PEN_LANES)
    w_in_p = _pad_flat(w_in, total, 0).reshape(rows_p, _PEN_LANES)
    rho_p = _pad_flat(rho, total, 1).reshape(rows_p, _PEN_LANES)
    var_in_p = _pad_flat(var_in, total, 1).reshape(rows_p, _PEN_LANES)

    in_spec = pl.BlockSpec((tile_rows, _PEN_LANES), lambda c, i: (c * bps + i, 0))

    partials = pl.pallas_call(
        _penalty_kernel,
        out_shape=jax.ShapeDtypeStruct((_PEN_SPLITS, 1, 1), jnp.float32),
        grid_spec=pltpu.PrefetchScalarGridSpec(
            num_scalar_prefetch=0,
            grid=(_PEN_SPLITS, bps),
            in_specs=[in_spec] * 4,
            out_specs=pl.BlockSpec((1, 1, 1), lambda c, i: (c, 0, 0)),
            scratch_shapes=[pltpu.VMEM((tile_rows, _PEN_LANES), jnp.float32)],
        ),
        compiler_params=pltpu.CompilerParams(
            dimension_semantics=("parallel", "arbitrary")),
    )(w_p, w_in_p, rho_p, var_in_p)
    return jnp.sum(partials)              # tiny 2-element add in JAX


def penalty(params, buffers):
    """StochLayer.Penalty(): weight + bias terms fused into one pallas_call."""
    w = jnp.concatenate([params["weight"].reshape(-1), params["bias"].reshape(-1)])
    w_in = jnp.concatenate([buffers["weight_in"].reshape(-1),
                            buffers["bias_in"].reshape(-1)])
    rho = jnp.concatenate([params["weight_rho"].reshape(-1),
                           params["bias_rho"].reshape(-1)])
    var_in = jnp.concatenate([buffers["weight_var_in"].reshape(-1),
                              buffers["bias_var_in"].reshape(-1)])
    return _penalty_sum(w, w_in, rho, var_in)


# ----------------------------------------------------------------------------
# Functional StochLayer (Conv2d mother), deterministic init
# ----------------------------------------------------------------------------
def init_stoch_layer(key, out_channels, in_channels, kh, kw,
                     weight_v=1e-4, bias_v=1e-4):
    """Mirror StochLayer.__init__ with a Conv2d mother, deterministically."""
    kw_, kb_ = jax.random.split(key)
    fan_in = in_channels * kh * kw
    bound = 1.0 / math.sqrt(fan_in)

    weight = jax.random.uniform(kw_, (out_channels, in_channels, kh, kw),
                                jnp.float32, -bound, bound)
    bias = jax.random.uniform(kb_, (out_channels,), jnp.float32, -bound, bound)

    # set_vars: rho = var ** (1/3), full tensors
    weight_rho = jnp.full(weight.shape, weight_v ** (1.0 / 3.0), jnp.float32)
    bias_rho = jnp.full(bias.shape, bias_v ** (1.0 / 3.0), jnp.float32)

    # freeze_in: buffers frozen at init time (std via the Pallas kernel);
    # var_in = std_in^2 is pre-baked once so the penalty kernel streams it directly.
    w_std_in = rho_to_std(weight_rho)
    b_std_in = rho_to_std(bias_rho)
    buffers = dict(
        weight_in=weight,
        weight_std_in=w_std_in,
        weight_var_in=w_std_in * w_std_in,
        bias_in=bias,
        bias_std_in=b_std_in,
        bias_var_in=b_std_in * b_std_in,
    )
    params = dict(weight=weight, bias=bias,
                  weight_rho=weight_rho, bias_rho=bias_rho)
    return params, buffers


# ----------------------------------------------------------------------------
# Pure-JAX references (for correctness check only)
# ----------------------------------------------------------------------------
def _ref_std(rho):
    return jnp.abs(rho) ** 1.5


def _ref_penalty_term(w, w_in, rho, std_in):
    std = _ref_std(rho)
    term = ((w - w_in) ** 2 + (std ** 2 - std_in ** 2)) / std_in ** 2 \
        + jnp.log(std_in ** 2 / std ** 2)
    return 0.5 * jnp.sum(term)


# ----------------------------------------------------------------------------
if __name__ == "__main__":
    key = jax.random.PRNGKey(0)
    k_init, k_dw, k_db = jax.random.split(key, 3)

    # Small Conv2d mother: in_channels=4, out_channels=8, kernel_size=3.
    params, buffers = init_stoch_layer(k_init, out_channels=8, in_channels=4,
                                       kh=3, kw=3, weight_v=1e-4, bias_v=1e-4)

    # Simulate a few "training" updates so the penalty is non-trivial
    # (right after __init__ the penalty is exactly 0 by construction).
    params = dict(params)
    params["weight"] = params["weight"] + 0.01 * jax.random.normal(
        k_dw, params["weight"].shape, jnp.float32)
    params["bias"] = params["bias"] + 0.01 * jax.random.normal(
        k_db, params["bias"].shape, jnp.float32)
    params["weight_rho"] = params["weight_rho"] * 1.25
    params["bias_rho"] = params["bias_rho"] * 0.8

    # --- run Pallas kernels ---
    w_std = jax.block_until_ready(rho_to_std(params["weight_rho"]))
    b_std = jax.block_until_ready(rho_to_std(params["bias_rho"]))
    pen = jax.block_until_ready(penalty(params, buffers))

    # --- check against pure-JAX reference ---
    ref_w_std = _ref_std(params["weight_rho"])
    ref_b_std = _ref_std(params["bias_rho"])
    ref_pen = _ref_penalty_term(params["weight"], buffers["weight_in"],
                                params["weight_rho"], buffers["weight_std_in"]) \
        + _ref_penalty_term(params["bias"], buffers["bias_in"],
                            params["bias_rho"], buffers["bias_std_in"])

    assert jnp.allclose(w_std, ref_w_std, rtol=1e-5, atol=1e-6)
    assert jnp.allclose(b_std, ref_b_std, rtol=1e-5, atol=1e-6)
    assert jnp.allclose(pen, ref_pen, rtol=1e-4, atol=1e-4)

    print("KERNEL_OK")
</pallas_src>

<mosaic_0001>
module attributes {stable_mosaic.version = 11 : i64} {
  func.func @_rho_to_std_kernel(%arg0: i32, %arg1: memref<8x128xf32, #tpu.memory_space<vmem>>, %arg2: memref<8x128xf32, #tpu.memory_space<vmem>>) attributes {dimension_semantics = [#tpu.dimension_semantics<parallel>], iteration_bounds = array<i64: 1>, scalar_prefetch = 0 : i64, scratch_operands = 0 : i64, tpu.core_type = #tpu.core_type<tc>, window_params = [{transform_indices = @transform_0, window_bounds = array<i64: 8, 128>}, {transform_indices = @transform_1, window_bounds = array<i64: 8, 128>}]} {
    %c0 = arith.constant 0 : index
    %c0_0 = arith.constant 0 : index
    %0 = vector.load %arg1[%c0, %c0_0] : memref<8x128xf32, #tpu.memory_space<vmem>>, vector<8x128xf32>
    %1 = math.absf %0 : vector<8x128xf32>
    %2 = math.sqrt %1 : vector<8x128xf32>
    %3 = arith.mulf %1, %2 : vector<8x128xf32>
    %c0_1 = arith.constant 0 : index
    %c0_2 = arith.constant 0 : index
    %4 = vector.load %arg2[%c0_1, %c0_2] : memref<8x128xf32, #tpu.memory_space<vmem>>, vector<8x128xf32>
    tpu.vector_store %arg2[%c0_1, %c0_2], %3 {strides = array<i32>} : memref<8x128xf32, #tpu.memory_space<vmem>>, vector<8x128xf32>,
    return
  }
  func.func @transform_0(%arg0: i32) -> (i32, i32) {
    %c0_i32 = arith.constant 0 : i32
    %c0_i32_0 = arith.constant 0 : i32
    return %arg0, %c0_i32 : i32, i32
  }
  func.func @transform_1(%arg0: i32) -> (i32, i32) {
    %c0_i32 = arith.constant 0 : i32
    %c0_i32_0 = arith.constant 0 : i32
    return %arg0, %c0_i32 : i32, i32
  }
}

</mosaic_0001>

<bundles_post_ra>
// kernel: tpu_custom_call.1
= control target key start
LH: loop header
LB: loop body
LE: loop exit
PB: predicated region body
PF: predicated region fallthrough
CT: control target
= control target key end

     0   :  { %6 = vsyncpa [#allocation3], 0  ;;  %s135_s0 = inlined_call_operand.hbm [shape: f32[8,128], index: 0, kind: input, shape index: {}]   ;;  %s136_s1 = inlined_call_operand.hbm [shape: f32[8,128], index: 1, kind: output, shape index: {}]  }
   0x1   :  { %7 = vsyncpa [#allocation4], 0  ;;  %s99_s6 = smov [#allocation2]   ;;  %s51_s10 = scalar_lea.hbm %s135_s0, 128 }
   0x2   :  { %s14_s7 = sshll.u32 %s99_s6, 4  ;;  %p52_p0 = scmp.ne.s32.totalorder %s135_s0, %s51_s10  ;;  %s15_s7 = int_to_ptr.vmem [resolvable:$true] %s14_s7 }
   0x3   :  { %p55_p1 = scmp.lt.u32.totalorder %s51_s10, %s135_s0 }
   0x5   :  { %p57_p2 = pnand %p55_p1, %p52_p0 }
   0x7   :  { %60 = shalt.err (!%p57_p2)
}
   0x8   :  { %s61_s15 = scalar_lea.vmem %s15_s7, 128  ;;  %p66_p4 = scmp.lt.s32.totalorder %s15_s7, %s15_s7 }
   0x9   :  { %p62_p3 = scmp.ne.s32.totalorder %s15_s7, %s61_s15  ;;  %p67_p5 = scmp.lt.s32.totalorder %s61_s15, %s61_s15 }
   0xb   :  { %p68_p6 = por %p67_p5, %p66_p4 }
   0xd   :  { %p69_p7 = pnand %p68_p6, %p62_p3 }
   0xf   :  { %72 = shalt.err (!%p69_p7)
}
  0x10   :  { %17 = dma.hbm_to_vmem [thread:$0]  %s135_s0, 128, %s15_s7, [#allocation3]  }
  0x11   :  { %95 = dma.done.wait [#allocation3], 128  }
  0x12   :  { %96 = vsyncadd [#allocation3], 4294967168  ;;  %v21_v0 = vld [vmem:[#allocation2] sm:$0xff]  ;;  %s100_s18 = smov [#allocation5]  }
  0x13   :  { %v22_v1 = vand.u32 2147483647, %v21_v0  ;;  %s38_s19 = sshll.u32 %s100_s18, 4  ;;  %s39_s19 = int_to_ptr.vmem [resolvable:$true] %s38_s19 }
  0x14   :  { %s73_s20 = scalar_lea.vmem %s39_s19, 128  ;;  %p78_p9 = scmp.lt.s32.totalorder %s39_s19, %s39_s19 }
  0x15   :  { %49 = vrsqrt.f32 %v22_v1  ;;  %vm25_vm0 = vcmp.eq.f32.partialorder %v22_v1, inf  ;;  %v28_v3 = vand.u32 2147483648, %v22_v1  ;;  %vm27_vm1 = vcmp.eq.f32.partialorder %v22_v1, 0.0  ;;  %p74_p8 = scmp.ne.s32.totalorder %s39_s19, %s73_s20  ;;  %p79_p10 = scmp.lt.s32.totalorder %s73_s20, %s73_s20 }
  0x17   :  { %p80_p11 = por %p79_p10, %p78_p9 }
  0x19   :  { %p81_p12 = pnand %p80_p11, %p74_p8 }
  0x1f   :  { %v50_v2 = vpop.eup %49 }
  0x20   :  { %v24_v4 = vmul.f32 %v50_v2, %v22_v1 }
  0x22   :  { %v26_v5 = vsel %vm25_vm0, %v22_v1, %v24_v4 }
  0x23   :  { %v29_v6 = vsel %vm27_vm1, %v28_v3, %v26_v5 }
  0x24   :  { %v30_v7 = vmul.f32 %v29_v6, %v22_v1 }
  0x26   :  { %31 = vst [vmem:[#allocation5] sm:$0xff] %v30_v7 }
  0x27   :  { %84 = shalt.err (!%p81_p12)
}
  0x28   :  { %s85_s22 = scalar_lea.hbm %s136_s1, 128 }
  0x29   :  { %p86_p13 = scmp.ne.s32.totalorder %s136_s1, %s85_s22  ;;  %p89_p0 = scmp.lt.u32.totalorder %s85_s22, %s136_s1 }
  0x2b   :  { %p91_p1 = pnand %p89_p0, %p86_p13 }
  0x2d   :  { %94 = shalt.err (!%p91_p1)
}
  0x2e   :  { %41 = dma.vmem_to_hbm [thread:$0]  %s39_s19, 128, %s136_s1, [#allocation4]  }
  0x2f   :  { %97 = dma.done.wait [#allocation4], 128  }
  0x30   :  { %98 = vsyncadd [#allocation4], 4294967168 }
  0x31   :  { %45 = vsyncpa [#allocation3], 1 }
  0x32   :  { %46 = vsyncpa [#allocation4], 1 }

</bundles_post_ra>
